<compile_context>
chip_gen: v5e
topology: v5e:2x2
jax: 0.10.0
libtpu: 0.0.40
codegen_flags: <defaults>
</compile_context>

<pallas_src>
import functools

import jax
import jax.numpy as jnp
from jax import lax
from jax.experimental import pallas as pl
from jax.experimental.pallas import tpu as pltpu


def msa_kernel(xq_ref, xkv_ref, wq_ref, bq_ref, wkv_ref, bkv_ref, o_ref,
               q_scr, m_scr, l_scr, acc_scr, *, n_heads, d_head, compute_dtype):
    d = n_heads * d_head
    ikv = pl.program_id(2)
    cdt = compute_dtype

    # --- init accumulators + compute (pre-scaled) Q once per (batch, q-tile) ---
    @pl.when(ikv == 0)
    def _():
        m_scr[...] = jnp.full_like(m_scr, -jnp.inf)
        l_scr[...] = jnp.zeros_like(l_scr)
        acc_scr[...] = jnp.zeros_like(acc_scr)
        q = jnp.dot(xq_ref[...].astype(cdt), wq_ref[...].astype(cdt),
                    preferred_element_type=jnp.float32)
        q = q + bq_ref[...].astype(jnp.float32)
        q_scr[...] = q * (1.0 / (d_head ** 0.5))   # scale on q, not on (N,N) scores

    # --- K/V projection for this kv tile: one fused (tkv, d) @ (d, 2d) matmul ---
    kv = jnp.dot(xkv_ref[...].astype(cdt), wkv_ref[...].astype(cdt),
                 preferred_element_type=jnp.float32)
    kv = kv + bkv_ref[...].astype(jnp.float32)      # [:, :d] = K heads, [:, d:] = V heads

    # --- per-head online-softmax update (static, unrolled over a small H) ---
    for h in range(n_heads):
        lo, hi = h * d_head, (h + 1) * d_head
        qh = q_scr[:, lo:hi]                        # (tq, dh), already scaled, f32
        kh = kv[:, lo:hi]                           # (tkv, dh)
        vh = kv[:, d + lo:d + hi]                   # (tkv, dh)
        # contract last dim of q against last dim of k (no explicit k.T transpose)
        s = lax.dot_general(qh.astype(cdt), kh.astype(cdt),
                            (((1,), (1,)), ((), ())),
                            preferred_element_type=jnp.float32)       # (tq, tkv)
        m_prev = m_scr[h]                                              # (tq, 1)
        m_new = jnp.maximum(m_prev, jnp.max(s, axis=-1, keepdims=True))
        alpha = jnp.exp(m_prev - m_new)
        p = jnp.exp(s - m_new)
        l_scr[h] = alpha * l_scr[h] + jnp.sum(p, axis=-1, keepdims=True)
        acc_scr[h] = alpha * acc_scr[h] + jnp.dot(p.astype(cdt), vh.astype(cdt),
                                                  preferred_element_type=jnp.float32)
        m_scr[h] = m_new

    # --- finalize: normalize after PV (EUP reciprocal), ONE lane-dense store ---
    @pl.when(ikv == pl.num_programs(2) - 1)
    def _():
        outs = [acc_scr[h] * pl.reciprocal(l_scr[h], approx=False)
                for h in range(n_heads)]
        o_ref[...] = jnp.concatenate(outs, axis=-1).astype(o_ref.dtype)


def _block_diag_t(w):
    """(H, dh, dh) PyTorch (out, in) per-head weights -> (H*dh, H*dh) block-diagonal
    of w[h].T, so that x_full @ BD applies each head's Linear to its feature slice."""
    H, dh, _ = w.shape
    wt = jnp.transpose(w, (0, 2, 1))                       # (H, in, out)
    eye = jnp.eye(H, dtype=w.dtype)
    bd = wt[:, None, :, :] * eye[:, :, None, None]         # (h, g, in, out)
    return bd.transpose(0, 2, 1, 3).reshape(H * dh, H * dh)


def _pick_tile(n, cap):
    if n <= cap:
        return n
    for t in range(cap, 7, -1):
        if n % t == 0 and t % 8 == 0:
            return t
    return n


def msa_forward(x, wq, wk, wv, bq, bk, bv, n_heads,
                *, tile_q=None, tile_kv=None, compute_dtype=None):
    """x: (B, N, d). w*: (H, dh, dh) PyTorch (out, in) layout. b*: (H, dh)."""
    B, N, d = x.shape
    H = n_heads
    assert d % H == 0, "d must be divisible by n_heads"
    dh = d // H
    cdt = x.dtype if compute_dtype is None else compute_dtype

    # Tile caps sized for v7x's 64 MiB VMEM (also fine on v5e/v6e): bigger blocks
    # in bf16 since q/k/v/scores tiles halve.
    cap = 512 if jnp.dtype(cdt) == jnp.dtype(jnp.bfloat16) else 256
    tq = tile_q if tile_q is not None else _pick_tile(N, cap)
    tkv = tile_kv if tile_kv is not None else _pick_tile(N, cap)
    assert N % tq == 0 and N % tkv == 0
    nq, nkv = N // tq, N // tkv

    # Fused block-diagonal projection weights: one wide matmul for Q, one for K|V.
    wq_bd = _block_diag_t(wq)                                                  # (d, d)
    wkv_bd = jnp.concatenate([_block_diag_t(wk), _block_diag_t(wv)], axis=1)   # (d, 2d)
    bq_full = bq.reshape(1, d)
    bkv_full = jnp.concatenate([bk.reshape(1, d), bv.reshape(1, d)], axis=1)   # (1, 2d)

    kernel = functools.partial(msa_kernel, n_heads=H, d_head=dh, compute_dtype=cdt)

    flops = (2 * B * N * d * d                 # Q projection
             + 2 * B * nq * N * d * 2 * d      # K/V projection (per q-tile)
             + 4 * B * H * N * N * dh)         # scores + PV
    cost = pl.CostEstimate(
        flops=int(flops),
        transcendentals=int(B * H * N * N),
        bytes_accessed=int((x.size * (1 + nq) + wq_bd.size + wkv_bd.size
                            + B * N * d) * x.dtype.itemsize),
    )

    grid_spec = pltpu.PrefetchScalarGridSpec(
        num_scalar_prefetch=0,
        grid=(B, nq, nkv),
        in_specs=[
            pl.BlockSpec((None, tq, d), lambda b, iq, ikv: (b, iq, 0)),    # x rows for Q
            pl.BlockSpec((None, tkv, d), lambda b, iq, ikv: (b, ikv, 0)),  # x rows for K/V
            pl.BlockSpec((d, d), lambda b, iq, ikv: (0, 0)),               # Wq (block-diag)
            pl.BlockSpec((1, d), lambda b, iq, ikv: (0, 0)),               # bq
            pl.BlockSpec((d, 2 * d), lambda b, iq, ikv: (0, 0)),           # Wk|Wv (block-diag)
            pl.BlockSpec((1, 2 * d), lambda b, iq, ikv: (0, 0)),           # bk|bv
        ],
        out_specs=pl.BlockSpec((None, tq, d), lambda b, iq, ikv: (b, iq, 0)),
        scratch_shapes=[
            pltpu.VMEM((tq, d), jnp.float32),       # scaled Q (computed once per q-tile)
            pltpu.VMEM((H, tq, 1), jnp.float32),    # running max  (online softmax)
            pltpu.VMEM((H, tq, 1), jnp.float32),    # running sum
            pltpu.VMEM((H, tq, dh), jnp.float32),   # output accumulator
        ],
    )

    return pl.pallas_call(
        kernel,
        out_shape=jax.ShapeDtypeStruct((B, N, d), x.dtype),
        grid_spec=grid_spec,
        compiler_params=pltpu.CompilerParams(
            dimension_semantics=("parallel", "parallel", "arbitrary")),
        cost_estimate=cost,
    )(x, x, wq_bd, bq_full, wkv_bd, bkv_full)


def msa_reference(x, wq, wk, wv, bq, bk, bv, n_heads):
    """Pure-JAX reference mirroring the PyTorch loop semantics."""
    B, N, d = x.shape
    dh = d // n_heads
    outs = []
    for b in range(B):
        head_outs = []
        for h in range(n_heads):
            seq = x[b, :, h * dh:(h + 1) * dh]
            q = seq @ wq[h].T + bq[h]
            k = seq @ wk[h].T + bk[h]
            v = seq @ wv[h].T + bv[h]
            s = (q @ k.T) / (dh ** 0.5)
            a = jax.nn.softmax(s, axis=-1)
            head_outs.append(a @ v)
        outs.append(jnp.concatenate(head_outs, axis=-1))
    return jnp.stack(outs, axis=0)


if __name__ == "__main__":
    B, N, d, n_heads = 2, 8, 32, 2
    dh = d // n_heads

    key = jax.random.PRNGKey(0)
    kx, kq, kk, kv, kbq, kbk, kbv = jax.random.split(key, 7)

    x = jax.random.normal(kx, (B, N, d), dtype=jnp.float32)
    # PyTorch Linear weight layout (out, in) per head
    wq = jax.random.normal(kq, (n_heads, dh, dh), dtype=jnp.float32) * 0.1
    wk = jax.random.normal(kk, (n_heads, dh, dh), dtype=jnp.float32) * 0.1
    wv = jax.random.normal(kv, (n_heads, dh, dh), dtype=jnp.float32) * 0.1
    bq = jax.random.normal(kbq, (n_heads, dh), dtype=jnp.float32) * 0.1
    bk = jax.random.normal(kbk, (n_heads, dh), dtype=jnp.float32) * 0.1
    bv = jax.random.normal(kbv, (n_heads, dh), dtype=jnp.float32) * 0.1

    out = msa_forward(x, wq, wk, wv, bq, bk, bv, n_heads)
    out = jax.block_until_ready(out)

    ref = msa_reference(x, wq, wk, wv, bq, bk, bv, n_heads)
    assert out.shape == (B, N, d)
    assert jnp.allclose(out, ref, atol=1e-4, rtol=1e-4), "mismatch vs reference"

    print("KERNEL_OK")
</pallas_src>

<mosaic_0001>
module attributes {stable_mosaic.version = 11 : i64} {
  func.func @msa_kernel(%arg0: i32, %arg1: i32, %arg2: i32, %arg3: memref<1x8x32xf32, #tpu.memory_space<vmem>>, %arg4: memref<1x8x32xf32, #tpu.memory_space<vmem>>, %arg5: memref<32x32xf32, #tpu.memory_space<vmem>>, %arg6: memref<1x32xf32, #tpu.memory_space<vmem>>, %arg7: memref<32x64xf32, #tpu.memory_space<vmem>>, %arg8: memref<1x64xf32, #tpu.memory_space<vmem>>, %arg9: memref<1x8x32xf32, #tpu.memory_space<vmem>>, %arg10: memref<8x32xf32, #tpu.memory_space<vmem>>, %arg11: memref<2x8x1xf32, #tpu.memory_space<vmem>>, %arg12: memref<2x8x1xf32, #tpu.memory_space<vmem>>, %arg13: memref<2x8x16xf32, #tpu.memory_space<vmem>>) attributes {dimension_semantics = [#tpu.dimension_semantics<parallel>, #tpu.dimension_semantics<parallel>, #tpu.dimension_semantics<arbitrary>], iteration_bounds = array<i64: 2, 1, 1>, scalar_prefetch = 0 : i64, scratch_operands = 4 : i64, tpu.core_type = #tpu.core_type<tc>, window_params = [{transform_indices = @transform_0, window_bounds = array<i64: 1, 8, 32>}, {transform_indices = @transform_1, window_bounds = array<i64: 1, 8, 32>}, {pipeline_mode = #tpu.pipeline_mode<synchronous>, transform_indices = @transform_2, window_bounds = array<i64: 32, 32>}, {pipeline_mode = #tpu.pipeline_mode<synchronous>, transform_indices = @transform_3, window_bounds = array<i64: 1, 32>}, {pipeline_mode = #tpu.pipeline_mode<synchronous>, transform_indices = @transform_4, window_bounds = array<i64: 32, 64>}, {pipeline_mode = #tpu.pipeline_mode<synchronous>, transform_indices = @transform_5, window_bounds = array<i64: 1, 64>}, {transform_indices = @transform_6, window_bounds = array<i64: 1, 8, 32>}]} {
    %c0_i32 = arith.constant 0 : i32
    %0 = arith.cmpi eq, %arg2, %c0_i32 : i32
    %1 = arith.extui %0 : i1 to i32
    %c0_i32_0 = arith.constant 0 : i32
    %2 = arith.cmpi ne, %1, %c0_i32_0 : i32
    scf.if %2 {
      %cst_55 = arith.constant 0xFF800000 : f32
      %83 = vector.broadcast %cst_55 : f32 to vector<2x8x1xf32>
      %c0_56 = arith.constant 0 : index
      %c0_57 = arith.constant 0 : index
      %c0_58 = arith.constant 0 : index
      %84 = vector.load %arg11[%c0_56, %c0_57, %c0_58] : memref<2x8x1xf32, #tpu.memory_space<vmem>>, vector<2x8x1xf32>
      tpu.vector_store %arg11[%c0_56, %c0_57, %c0_58], %83 {strides = array<i32>} : memref<2x8x1xf32, #tpu.memory_space<vmem>>, vector<2x8x1xf32>,
      %cst_59 = arith.constant 0.000000e+00 : f32
      %85 = vector.broadcast %cst_59 : f32 to vector<2x8x1xf32>
      %c0_60 = arith.constant 0 : index
      %c0_61 = arith.constant 0 : index
      %c0_62 = arith.constant 0 : index
      %86 = vector.load %arg12[%c0_60, %c0_61, %c0_62] : memref<2x8x1xf32, #tpu.memory_space<vmem>>, vector<2x8x1xf32>
      tpu.vector_store %arg12[%c0_60, %c0_61, %c0_62], %85 {strides = array<i32>} : memref<2x8x1xf32, #tpu.memory_space<vmem>>, vector<2x8x1xf32>,
      %cst_63 = arith.constant 0.000000e+00 : f32
      %87 = vector.broadcast %cst_63 : f32 to vector<2x8x16xf32>
      %c0_64 = arith.constant 0 : index
      %c0_65 = arith.constant 0 : index
      %c0_66 = arith.constant 0 : index
      %88 = vector.load %arg13[%c0_64, %c0_65, %c0_66] : memref<2x8x16xf32, #tpu.memory_space<vmem>>, vector<2x8x16xf32>
      tpu.vector_store %arg13[%c0_64, %c0_65, %c0_66], %87 {strides = array<i32>} : memref<2x8x16xf32, #tpu.memory_space<vmem>>, vector<2x8x16xf32>,
      %c0_67 = arith.constant 0 : index
      %c0_68 = arith.constant 0 : index
      %c0_69 = arith.constant 0 : index
      %89 = vector.load %arg3[%c0_67, %c0_68, %c0_69] : memref<1x8x32xf32, #tpu.memory_space<vmem>>, vector<1x8x32xf32>
      %90 = vector.shape_cast %89 : vector<1x8x32xf32> to vector<8x32xf32>
      %c0_70 = arith.constant 0 : index
      %c0_71 = arith.constant 0 : index
      %91 = vector.load %arg5[%c0_70, %c0_71] : memref<32x32xf32, #tpu.memory_space<vmem>>, vector<32x32xf32>
      %cst_72 = arith.constant dense<0.000000e+00> : vector<8x32xf32>
      %92 = tpu.matmul %90, %91, %cst_72 {dimension_numbers = #tpu.dot_dimension_numbers<[1], [0], [0], [1], [0, 0, 1, 1], [], []>} : vector<8x32xf32>, vector<32x32xf32>, vector<8x32xf32> -> vector<8x32xf32>
      %c0_73 = arith.constant 0 : index
      %c0_74 = arith.constant 0 : index
      %93 = vector.load %arg6[%c0_73, %c0_74] : memref<1x32xf32, #tpu.memory_space<vmem>>, vector<1x32xf32>
      %94 = vector.broadcast %93 : vector<1x32xf32> to vector<8x32xf32>
      %95 = arith.addf %92, %94 : vector<8x32xf32>
      %cst_75 = arith.constant 2.500000e-01 : f32
      %96 = vector.broadcast %cst_75 : f32 to vector<8x32xf32>
      %97 = arith.mulf %95, %96 : vector<8x32xf32>
      %c0_76 = arith.constant 0 : index
      %c0_77 = arith.constant 0 : index
      %98 = vector.load %arg10[%c0_76, %c0_77] : memref<8x32xf32, #tpu.memory_space<vmem>>, vector<8x32xf32>
      tpu.vector_store %arg10[%c0_76, %c0_77], %97 {strides = array<i32>} : memref<8x32xf32, #tpu.memory_space<vmem>>, vector<8x32xf32>,
    } else {
    }
    %c0 = arith.constant 0 : index
    %c0_1 = arith.constant 0 : index
    %c0_2 = arith.constant 0 : index
    %3 = vector.load %arg4[%c0, %c0_1, %c0_2] : memref<1x8x32xf32, #tpu.memory_space<vmem>>, vector<1x8x32xf32>
    %4 = vector.shape_cast %3 : vector<1x8x32xf32> to vector<8x32xf32>
    %c0_3 = arith.constant 0 : index
    %c0_4 = arith.constant 0 : index
    %5 = vector.load %arg7[%c0_3, %c0_4] : memref<32x64xf32, #tpu.memory_space<vmem>>, vector<32x64xf32>
    %cst = arith.constant dense<0.000000e+00> : vector<8x64xf32>
    %6 = tpu.matmul %4, %5, %cst {dimension_numbers = #tpu.dot_dimension_numbers<[1], [0], [0], [1], [0, 0, 1, 1], [], []>} : vector<8x32xf32>, vector<32x64xf32>, vector<8x64xf32> -> vector<8x64xf32>
    %c0_5 = arith.constant 0 : index
    %c0_6 = arith.constant 0 : index
    %7 = vector.load %arg8[%c0_5, %c0_6] : memref<1x64xf32, #tpu.memory_space<vmem>>, vector<1x64xf32>
    %8 = vector.broadcast %7 : vector<1x64xf32> to vector<8x64xf32>
    %9 = arith.addf %6, %8 : vector<8x64xf32>
    %c0_7 = arith.constant 0 : index
    %c0_8 = arith.constant 0 : index
    %10 = vector.load %arg10[%c0_7, %c0_8] : memref<8x32xf32, #tpu.memory_space<vmem>>, vector<8x16xf32>
    %11 = vector.extract_strided_slice %9 {offsets = [0, 0], sizes = [8, 16], strides = [1, 1]} : vector<8x64xf32> to vector<8x16xf32>
    %12 = vector.extract_strided_slice %9 {offsets = [0, 32], sizes = [8, 16], strides = [1, 1]} : vector<8x64xf32> to vector<8x16xf32>
    %cst_9 = arith.constant dense<0.000000e+00> : vector<8x8xf32>
    %13 = tpu.matmul %10, %11, %cst_9 {dimension_numbers = #tpu.dot_dimension_numbers<[1], [1], [0], [0], [0, 0, 1, 0], [], []>} : vector<8x16xf32>, vector<8x16xf32>, vector<8x8xf32> -> vector<8x8xf32>
    %c0_10 = arith.constant 0 : index
    %c0_11 = arith.constant 0 : index
    %c0_12 = arith.constant 0 : index
    %14 = vector.load %arg11[%c0_10, %c0_11, %c0_12] : memref<2x8x1xf32, #tpu.memory_space<vmem>>, vector<1x8x1xf32>
    %15 = vector.shape_cast %14 : vector<1x8x1xf32> to vector<8x1xf32>
    %cst_13 = arith.constant dense<0xFF800000> : vector<8xf32>
    %16 = vector.multi_reduction <maximumf>, %13, %cst_13 [1] : vector<8x8xf32> to vector<8xf32>
    %17 = vector.shape_cast %16 : vector<8xf32> to vector<8x1xf32>
    %18 = arith.maximumf %15, %17 : vector<8x1xf32>
    %19 = arith.subf %15, %18 : vector<8x1xf32>
    %20 = math.exp %19 : vector<8x1xf32>
    %21 = vector.broadcast %18 : vector<8x1xf32> to vector<8x8xf32>
    %22 = arith.subf %13, %21 : vector<8x8xf32>
    %23 = math.exp %22 : vector<8x8xf32>
    %c0_14 = arith.constant 0 : index
    %c0_15 = arith.constant 0 : index
    %c0_16 = arith.constant 0 : index
    %24 = vector.load %arg12[%c0_14, %c0_15, %c0_16] : memref<2x8x1xf32, #tpu.memory_space<vmem>>, vector<1x8x1xf32>
    %25 = vector.shape_cast %24 : vector<1x8x1xf32> to vector<8x1xf32>
    %26 = arith.mulf %20, %25 : vector<8x1xf32>
    %cst_17 = arith.constant dense<0.000000e+00> : vector<8xf32>
    %27 = vector.multi_reduction <add>, %23, %cst_17 [1] : vector<8x8xf32> to vector<8xf32>
    %28 = vector.shape_cast %27 : vector<8xf32> to vector<8x1xf32>
    %29 = arith.addf %26, %28 : vector<8x1xf32>
    %c0_18 = arith.constant 0 : index
    %c0_19 = arith.constant 0 : index
    %c0_20 = arith.constant 0 : index
    %30 = vector.load %arg12[%c0_18, %c0_19, %c0_20] : memref<2x8x1xf32, #tpu.memory_space<vmem>>, vector<1x8x1xf32>
    %31 = vector.shape_cast %30 : vector<1x8x1xf32> to vector<8x1xf32>
    %32 = vector.shape_cast %29 : vector<8x1xf32> to vector<1x8x1xf32>
    tpu.vector_store %arg12[%c0_18, %c0_19, %c0_20], %32 {strides = array<i32>} : memref<2x8x1xf32, #tpu.memory_space<vmem>>, vector<1x8x1xf32>,
    %c0_21 = arith.constant 0 : index
    %c0_22 = arith.constant 0 : index
    %c0_23 = arith.constant 0 : index
    %33 = vector.load %arg13[%c0_21, %c0_22, %c0_23] : memref<2x8x16xf32, #tpu.memory_space<vmem>>, vector<1x8x16xf32>
    %34 = vector.shape_cast %33 : vector<1x8x16xf32> to vector<8x16xf32>
    %35 = vector.broadcast %20 : vector<8x1xf32> to vector<8x16xf32>
    %36 = arith.mulf %35, %34 : vector<8x16xf32>
    %cst_24 = arith.constant dense<0.000000e+00> : vector<8x16xf32>
    %37 = tpu.matmul %23, %12, %cst_24 {dimension_numbers = #tpu.dot_dimension_numbers<[1], [0], [0], [1], [0, 0, 1, 1], [], []>} : vector<8x8xf32>, vector<8x16xf32>, vector<8x16xf32> -> vector<8x16xf32>
    %38 = arith.addf %36, %37 : vector<8x16xf32>
    %c0_25 = arith.constant 0 : index
    %c0_26 = arith.constant 0 : index
    %c0_27 = arith.constant 0 : index
    %39 = vector.load %arg13[%c0_25, %c0_26, %c0_27] : memref<2x8x16xf32, #tpu.memory_space<vmem>>, vector<1x8x16xf32>
    %40 = vector.shape_cast %39 : vector<1x8x16xf32> to vector<8x16xf32>
    %41 = vector.shape_cast %38 : vector<8x16xf32> to vector<1x8x16xf32>
    tpu.vector_store %arg13[%c0_25, %c0_26, %c0_27], %41 {strides = array<i32>} : memref<2x8x16xf32, #tpu.memory_space<vmem>>, vector<1x8x16xf32>,
    %c0_28 = arith.constant 0 : index
    %c0_29 = arith.constant 0 : index
    %c0_30 = arith.constant 0 : index
    %42 = vector.load %arg11[%c0_28, %c0_29, %c0_30] : memref<2x8x1xf32, #tpu.memory_space<vmem>>, vector<1x8x1xf32>
    %43 = vector.shape_cast %42 : vector<1x8x1xf32> to vector<8x1xf32>
    %44 = vector.shape_cast %18 : vector<8x1xf32> to vector<1x8x1xf32>
    tpu.vector_store %arg11[%c0_28, %c0_29, %c0_30], %44 {strides = array<i32>} : memref<2x8x1xf32, #tpu.memory_space<vmem>>, vector<1x8x1xf32>,
    %c0_31 = arith.constant 0 : index
    %c16 = arith.constant 16 : index
    %45 = vector.load %arg10[%c0_31, %c16] : memref<8x32xf32, #tpu.memory_space<vmem>>, vector<8x16xf32>
    %46 = vector.extract_strided_slice %9 {offsets = [0, 16], sizes = [8, 16], strides = [1, 1]} : vector<8x64xf32> to vector<8x16xf32>
    %47 = vector.extract_strided_slice %9 {offsets = [0, 48], sizes = [8, 16], strides = [1, 1]} : vector<8x64xf32> to vector<8x16xf32>
    %cst_32 = arith.constant dense<0.000000e+00> : vector<8x8xf32>
    %48 = tpu.matmul %45, %46, %cst_32 {dimension_numbers = #tpu.dot_dimension_numbers<[1], [1], [0], [0], [0, 0, 1, 0], [], []>} : vector<8x16xf32>, vector<8x16xf32>, vector<8x8xf32> -> vector<8x8xf32>
    %c1 = arith.constant 1 : index
    %c0_33 = arith.constant 0 : index
    %c0_34 = arith.constant 0 : index
    %49 = vector.load %arg11[%c1, %c0_33, %c0_34] : memref<2x8x1xf32, #tpu.memory_space<vmem>>, vector<1x8x1xf32>
    %50 = vector.shape_cast %49 : vector<1x8x1xf32> to vector<8x1xf32>
    %cst_35 = arith.constant dense<0xFF800000> : vector<8xf32>
    %51 = vector.multi_reduction <maximumf>, %48, %cst_35 [1] : vector<8x8xf32> to vector<8xf32>
    %52 = vector.shape_cast %51 : vector<8xf32> to vector<8x1xf32>
    %53 = arith.maximumf %50, %52 : vector<8x1xf32>
    %54 = arith.subf %50, %53 : vector<8x1xf32>
    %55 = math.exp %54 : vector<8x1xf32>
    %56 = vector.broadcast %53 : vector<8x1xf32> to vector<8x8xf32>
    %57 = arith.subf %48, %56 : vector<8x8xf32>
    %58 = math.exp %57 : vector<8x8xf32>
    %c1_36 = arith.constant 1 : index
    %c0_37 = arith.constant 0 : index
    %c0_38 = arith.constant 0 : index
    %59 = vector.load %arg12[%c1_36, %c0_37, %c0_38] : memref<2x8x1xf32, #tpu.memory_space<vmem>>, vector<1x8x1xf32>
    %60 = vector.shape_cast %59 : vector<1x8x1xf32> to vector<8x1xf32>
    %61 = arith.mulf %55, %60 : vector<8x1xf32>
    %cst_39 = arith.constant dense<0.000000e+00> : vector<8xf32>
    %62 = vector.multi_reduction <add>, %58, %cst_39 [1] : vector<8x8xf32> to vector<8xf32>
    %63 = vector.shape_cast %62 : vector<8xf32> to vector<8x1xf32>
    %64 = arith.addf %61, %63 : vector<8x1xf32>
    %c1_40 = arith.constant 1 : index
    %c0_41 = arith.constant 0 : index
    %c0_42 = arith.constant 0 : index
    %65 = vector.load %arg12[%c1_40, %c0_41, %c0_42] : memref<2x8x1xf32, #tpu.memory_space<vmem>>, vector<1x8x1xf32>
    %66 = vector.shape_cast %65 : vector<1x8x1xf32> to vector<8x1xf32>
    %67 = vector.shape_cast %64 : vector<8x1xf32> to vector<1x8x1xf32>
    tpu.vector_store %arg12[%c1_40, %c0_41, %c0_42], %67 {strides = array<i32>} : memref<2x8x1xf32, #tpu.memory_space<vmem>>, vector<1x8x1xf32>,
    %c1_43 = arith.constant 1 : index
    %c0_44 = arith.constant 0 : index
    %c0_45 = arith.constant 0 : index
    %68 = vector.load %arg13[%c1_43, %c0_44, %c0_45] : memref<2x8x16xf32, #tpu.memory_space<vmem>>, vector<1x8x16xf32>
    %69 = vector.shape_cast %68 : vector<1x8x16xf32> to vector<8x16xf32>
    %70 = vector.broadcast %55 : vector<8x1xf32> to vector<8x16xf32>
    %71 = arith.mulf %70, %69 : vector<8x16xf32>
    %cst_46 = arith.constant dense<0.000000e+00> : vector<8x16xf32>
    %72 = tpu.matmul %58, %47, %cst_46 {dimension_numbers = #tpu.dot_dimension_numbers<[1], [0], [0], [1], [0, 0, 1, 1], [], []>} : vector<8x8xf32>, vector<8x16xf32>, vector<8x16xf32> -> vector<8x16xf32>
    %73 = arith.addf %71, %72 : vector<8x16xf32>
    %c1_47 = arith.constant 1 : index
    %c0_48 = arith.constant 0 : index
    %c0_49 = arith.constant 0 : index
    %74 = vector.load %arg13[%c1_47, %c0_48, %c0_49] : memref<2x8x16xf32, #tpu.memory_space<vmem>>, vector<1x8x16xf32>
    %75 = vector.shape_cast %74 : vector<1x8x16xf32> to vector<8x16xf32>
    %76 = vector.shape_cast %73 : vector<8x16xf32> to vector<1x8x16xf32>
    tpu.vector_store %arg13[%c1_47, %c0_48, %c0_49], %76 {strides = array<i32>} : memref<2x8x16xf32, #tpu.memory_space<vmem>>, vector<1x8x16xf32>,
    %c1_50 = arith.constant 1 : index
    %c0_51 = arith.constant 0 : index
    %c0_52 = arith.constant 0 : index
    %77 = vector.load %arg11[%c1_50, %c0_51, %c0_52] : memref<2x8x1xf32, #tpu.memory_space<vmem>>, vector<1x8x1xf32>
    %78 = vector.shape_cast %77 : vector<1x8x1xf32> to vector<8x1xf32>
    %79 = vector.shape_cast %53 : vector<8x1xf32> to vector<1x8x1xf32>
    tpu.vector_store %arg11[%c1_50, %c0_51, %c0_52], %79 {strides = array<i32>} : memref<2x8x1xf32, #tpu.memory_space<vmem>>, vector<1x8x1xf32>,
    %c0_i32_53 = arith.constant 0 : i32
    %80 = arith.cmpi eq, %arg2, %c0_i32_53 : i32
    %81 = arith.extui %80 : i1 to i32
    %c0_i32_54 = arith.constant 0 : i32
    %82 = arith.cmpi ne, %81, %c0_i32_54 : i32
    scf.if %82 {
      %c0_55 = arith.constant 0 : index
      %c0_56 = arith.constant 0 : index
      %c0_57 = arith.constant 0 : index
      %83 = vector.load %arg13[%c0_55, %c0_56, %c0_57] : memref<2x8x16xf32, #tpu.memory_space<vmem>>, vector<1x8x16xf32>
      %84 = vector.shape_cast %83 : vector<1x8x16xf32> to vector<8x16xf32>
      %c0_58 = arith.constant 0 : index
      %c0_59 = arith.constant 0 : index
      %c0_60 = arith.constant 0 : index
      %85 = vector.load %arg12[%c0_58, %c0_59, %c0_60] : memref<2x8x1xf32, #tpu.memory_space<vmem>>, vector<1x8x1xf32>
      %86 = vector.shape_cast %85 : vector<1x8x1xf32> to vector<8x1xf32>
      %87 = tpu.reciprocal %86 : vector<8x1xf32> -> vector<8x1xf32>
      %88 = vector.broadcast %87 : vector<8x1xf32> to vector<8x16xf32>
      %89 = arith.mulf %84, %88 : vector<8x16xf32>
      %c1_61 = arith.constant 1 : index
      %c0_62 = arith.constant 0 : index
      %c0_63 = arith.constant 0 : index
      %90 = vector.load %arg13[%c1_61, %c0_62, %c0_63] : memref<2x8x16xf32, #tpu.memory_space<vmem>>, vector<1x8x16xf32>
      %91 = vector.shape_cast %90 : vector<1x8x16xf32> to vector<8x16xf32>
      %c1_64 = arith.constant 1 : index
      %c0_65 = arith.constant 0 : index
      %c0_66 = arith.constant 0 : index
      %92 = vector.load %arg12[%c1_64, %c0_65, %c0_66] : memref<2x8x1xf32, #tpu.memory_space<vmem>>, vector<1x8x1xf32>
      %93 = vector.shape_cast %92 : vector<1x8x1xf32> to vector<8x1xf32>
      %94 = tpu.reciprocal %93 : vector<8x1xf32> -> vector<8x1xf32>
      %95 = vector.broadcast %94 : vector<8x1xf32> to vector<8x16xf32>
      %96 = arith.mulf %91, %95 : vector<8x16xf32>
      %97 = tpu.concatenate %89, %96 in 1 : vector<8x16xf32>, vector<8x16xf32> -> vector<8x32xf32>
      %c0_67 = arith.constant 0 : index
      %c0_68 = arith.constant 0 : index
      %c0_69 = arith.constant 0 : index
      %98 = vector.load %arg9[%c0_67, %c0_68, %c0_69] : memref<1x8x32xf32, #tpu.memory_space<vmem>>, vector<1x8x32xf32>
      %99 = vector.shape_cast %98 : vector<1x8x32xf32> to vector<8x32xf32>
      %100 = vector.shape_cast %97 : vector<8x32xf32> to vector<1x8x32xf32>
      tpu.vector_store %arg9[%c0_67, %c0_68, %c0_69], %100 {strides = array<i32>} : memref<1x8x32xf32, #tpu.memory_space<vmem>>, vector<1x8x32xf32>,
    } else {
    }
    return
  }
  func.func @transform_0(%arg0: i32, %arg1: i32, %arg2: i32) -> (i32, i32, i32) {
    %c0_i32 = arith.constant 0 : i32
    %c0_i32_0 = arith.constant 0 : i32
    return %arg0, %arg1, %c0_i32 : i32, i32, i32
  }
  func.func @transform_1(%arg0: i32, %arg1: i32, %arg2: i32) -> (i32, i32, i32) {
    %c0_i32 = arith.constant 0 : i32
    %c0_i32_0 = arith.constant 0 : i32
    return %arg0, %arg2, %c0_i32 : i32, i32, i32
  }
  func.func @transform_2(%arg0: i32, %arg1: i32, %arg2: i32) -> (i32, i32) {
    %c0_i32 = arith.constant 0 : i32
    %c0_i32_0 = arith.constant 0 : i32
    %c0_i32_1 = arith.constant 0 : i32
    return %c0_i32, %c0_i32_0 : i32, i32
  }
  func.func @transform_3(%arg0: i32, %arg1: i32, %arg2: i32) -> (i32, i32) {
    %c0_i32 = arith.constant 0 : i32
    %c0_i32_0 = arith.constant 0 : i32
    %c0_i32_1 = arith.constant 0 : i32
    return %c0_i32, %c0_i32_0 : i32, i32
  }
  func.func @transform_4(%arg0: i32, %arg1: i32, %arg2: i32) -> (i32, i32) {
    %c0_i32 = arith.constant 0 : i32
    %c0_i32_0 = arith.constant 0 : i32
    %c0_i32_1 = arith.constant 0 : i32
    return %c0_i32, %c0_i32_0 : i32, i32
  }
  func.func @transform_5(%arg0: i32, %arg1: i32, %arg2: i32) -> (i32, i32) {
    %c0_i32 = arith.constant 0 : i32
    %c0_i32_0 = arith.constant 0 : i32
    %c0_i32_1 = arith.constant 0 : i32
    return %c0_i32, %c0_i32_0 : i32, i32
  }
  func.func @transform_6(%arg0: i32, %arg1: i32, %arg2: i32) -> (i32, i32, i32) {
    %c0_i32 = arith.constant 0 : i32
    %c0_i32_0 = arith.constant 0 : i32
    return %arg0, %arg1, %c0_i32 : i32, i32, i32
  }
}

</mosaic_0001>

<bundles_post_ra>
// kernel: tpu_custom_call.1
= control target key start
LH: loop header
LB: loop body
LE: loop exit
PB: predicated region body
PF: predicated region fallthrough
CT: control target
= control target key end

     0   :  { %s1432_s0 = inlined_call_operand.hbm [shape: f32[2,8,32], index: 0, kind: input, shape index: {}]   ;;  %s1433_s1 = inlined_call_operand.hbm [shape: f32[2,8,32], index: 1, kind: input, shape index: {}]   ;;  %s1434_s2 = inlined_call_operand.hbm [shape: f32[32,32], index: 2, kind: input, shape index: {}]   ;;  %s1435_s3 = inlined_call_operand.vmem [shape: f32[1,32], index: 3, kind: input, shape index: {}]   ;;  %s1436_s4 = inlined_call_operand.hbm [shape: f32[32,64], index: 4, kind: input, shape index: {}]   ;;  %s1437_s5 = inlined_call_operand.vmem [shape: f32[1,64], index: 5, kind: input, shape index: {}]   ;;  %s1438_s6 = inlined_call_operand.hbm [shape: f32[2,8,32], index: 6, kind: output, shape index: {}]  }
   0x1   :  { %1443 = sst [smem:[#allocation25_spill]] %s1434_s2 }
   0x2   :  { %1444 = sst [smem:[#allocation26_spill]] %s1436_s4 }
   0x3   :  { %11 = vsyncpa [#allocation7], 0 }
   0x4   :  { %13 = vsyncpa [#allocation7 + $0x1], 0 }
   0x5   :  { %14 = vsyncpa [#allocation10], 0 }
   0x6   :  { %16 = vsyncpa [#allocation10 + $0x1], 0 }
   0x7   :  { %17 = vsyncpa [#allocation13], 0 }
   0x8   :  { %18 = vsyncpa [#allocation8], 0 }
   0x9   :  { %20 = vsyncpa [#allocation8 + $0x1], 0  ;;  %s1229_s21 = smov 0   ;;  %s1231_s22 = smov 0  }
   0xa   :  { %s1233_s23 = smov 0   ;;  %s1235_s24 = smov 0  }
   0xb   :  { %s1237_s25 = smov 0   ;;  %s1239_s26 = smov 0  }
   0xc LB: > { %1445 = sst [smem:[#allocation20_spill]] %s1169_s23  ;;  %s1260_s27 = sadd.s32 4294967295, %s1181_s26   ;;  %s1181_s26 = sphi %s1239_s26, %s26_s26   ;;  %s1177_s25 = sphi %s1237_s25, %s1461_s25   ;;  %s1173_s24 = sphi %s1235_s24, %s1460_s24   ;;  %s1169_s23 = sphi %s1233_s23, %s1459_s23   ;;  %s1165_s22 = sphi %s1231_s22, %s1463_s22   ;;  %s1161_s21 = sphi %s1229_s21, %s1462_s21  }
   0xd   : > { %1446 = sst [smem:[#allocation21_spill]] %s1177_s25  ;;  %p827_p0 = scmp.ge.s32.totalorder %s1181_s26, 1 }
   0xe   : > { %p68_p1 = scmp.eq.s32.totalorder %s1260_s27, 0  ;;  %p218_p2 = scmp.lt.s32.totalorder %s1181_s26, 3 }
   0xf   : > { %s1447_s2 = sld [smem:[#allocation25_spill]]  ;;  %s1183_s8 = smov [#allocation11]  }
  0x10   : > { %p1268_p3 = pnand %p827_p0, %p218_p2  ;;  %s231_s9 = sshll.u32 %s1183_s8, 4  ;;  %s232_s9 = int_to_ptr.vmem [resolvable:$true] %s231_s9 }
  0x11   : > { %p830_p6 = scmp.ge.s32.totalorder %s1181_s26, 2  ;;  %s1449_s4 = sld [smem:[#allocation26_spill]] }
  0x12   : > { %p867_p4 = pneg %p1268_p3  ;;  %s1184_s13 = smov 128  }
  0x13   : > { %s1185_s14 = smov 8   ;;  %s1186_s15 = smov [#allocation12]  }
  0x14   : > { %p868_p5 = pnand %p867_p4, %p68_p1  ;;  %s248_s16 = sshll.u32 %s1186_s15, 4  ;;  %s249_s16 = int_to_ptr.vmem [resolvable:$true] %s248_s16 }
  0x15   : > { %s229_s30 = sshll.u32 %s1447_s2, 4  ;;  %s826_s17 = sadd.s32 4294967294, %s1181_s26   ;;  %s230_s30 = int_to_ptr.hbm [resolvable:$true] %s229_s30 }
  0x16   : > { %870 = dma.hbm_to_vmem [thread:$0]  (!%p868_p5), %s230_s30, 512, %s232_s9, [#allocation10], %s1184_s13, %s1184_s13, %s1185_s14  }
  0x17   : > { %s246_s12 = sshll.u32 %s1449_s4, 4  ;;  %s45_s18 = sadd.s32 1, %s1177_s25  ;;  %s247_s12 = int_to_ptr.hbm [resolvable:$true] %s246_s12 }
  0x18   : > { %873 = dma.hbm_to_vmem [thread:$0]  (!%p868_p5), %s247_s12, 512, %s249_s16, [#allocation13], %s1184_s13, %s1184_s13, %s1185_s14  }
  0x19   : > { %p47_p7 = scmp.ge.s32.totalorder %s45_s18, 2  ;;  %s54_s19 = sadd.s32 1, %s1169_s23 }
  0x1a   : > { %p61_p8 = scmp.ne.s32.totalorder %s1169_s23, %s1165_s22  ;;  %p62_p9 = scmp.eq.s32.totalorder %s1181_s26, 0 }
  0x1b   : > { %s1465_s18 = smov (%p47_p7, %s45_s18), 0  ;;  %p67_p11 = scmp.ne.s32.totalorder %s1165_s22, %s1161_s21 }
  0x1c   : > { %1450 = sst [smem:[#allocation22_spill]] %s1465_s18  ;;  %p1288_p10 = por %p62_p9, %p61_p8 }
  0x1d   : > { %s49_s28 = ssub.s32 %s1177_s25, %s1465_s18  ;;  %p205_p12 = scmp.eq.s32.totalorder %s1260_s27, 1 }
  0x1e   : > { %p52_p13 = scmp.eq.s32.totalorder %s49_s28, 0  ;;  %p1299_p0 = por %p68_p1, %p67_p11 }
  0x1f   : > { %p1303_p2 = por %p205_p12, %p61_p8  ;;  %p211_p4 = scmp.eq.s32.totalorder %s826_s17, 1 }
  0x20   : > { %s1308_s8 = scalar_select %p52_p13, %s1169_s23, %s54_s19  }
  0x21   : > { %p1310_p5 = por %p211_p4, %p67_p11  ;;  %p887_p7 = scmp.lt.s32.totalorder %s1181_s26, 2 }
  0x22   : > { %1454 = sst [smem:[#allocation23_spill]] %s1308_s8  ;;  %s265_s10 = sand.u32 1, %s1169_s23  }
  0x23   : > { %s1455_s9 = scalar_select %p1310_p5, 1, 0 }
  0x24   : > { %s832_s11 = sshll.u32 %s1177_s25, 3  ;;  %s831_s12 = sshll.u32 %s265_s10, 3 }
  0x25   : > { %1456 = sst [smem:[#allocation24_spill]] %s1455_s9  ;;  %s274_s15 = scalar_lea.hbm %s1432_s0, %s832_s11 }
  0x26   : > { %s276_s16 = sshll.u32 %s274_s15, 4  ;;  %s269_s28 = scalar_lea.vmem [#allocation6], %s831_s12  ;;  %s277_s16 = int_to_ptr.hbm [resolvable:$true] %s276_s16 }
  0x27   : > { %s278_s2 = sshll.u32 %s269_s28, 4  ;;  %p875_p8 = pnand %p887_p7, %p1288_p10  ;;  %s279_s2 = int_to_ptr.vmem [resolvable:$true] %s278_s2 }
  0x28   : > { %s294_s4 = scalar_lea.hbm %s1433_s1, %s832_s11  ;;  %s285_s18 = sand.u32 1, %s1181_s26  }
  0x29   : > { %s266_s8 = scalar_lea.sflag [#allocation7], %s265_s10  ;;  %s296_s25 = sshll.u32 %s294_s4, 4  ;;  %s297_s25 = int_to_ptr.hbm [resolvable:$true] %s296_s25 }
  0x2a   : > { %877 = dma.hbm_to_vmem [thread:$0]  (!%p875_p8), %s277_s16, 128, %s279_s2, %s266_s8  }
  0x2b   : > { %s289_s23 = scalar_lea.vmem [#allocation9], %s831_s12  ;;  %s286_s13 = scalar_lea.sflag [#allocation10], %s285_s18 }
  0x2c   : > { %s298_s9 = sshll.u32 %s289_s23, 4  ;;  %307 = sbr.rel (%p1268_p3) target bundleno = 1297 (0x511), region = 44  ;;  %s299_s9 = int_to_ptr.vmem [resolvable:$true] %s298_s9 }
  0x2d   : > { %880 = dma.hbm_to_vmem [thread:$0]  (!%p875_p8), %s297_s25, 128, %s299_s9, %s286_s13  }
  0x2e   : > { %s1329_s20 = sand.u32 (!%p1268_p3), 1, %s1165_s22  }
  0x2f   : > { %s1332_s11 = sshll.u32 (!%p1268_p3), %s1329_s20, 3  ;;  %s310_s2 = scalar_lea.sflag (!%p1268_p3), [#allocation7], %s1329_s20 }
  0x30   : > { %s313_s4 = scalar_lea.vmem (!%p1268_p3), [#allocation6], %s1332_s11 }
  0x31   : > { %1140 = dma.done.wait (%p1299_p0), %s310_s2, 128  }
  0x32   : > { %1142 = vsyncadd (%p1299_p0), %s310_s2, 4294967168  ;;  %s319_s23 = sand.u32 1, %s1260_s27   ;;  %s323_s7 = scalar_lea.vmem [#allocation9], %s1332_s11 }
  0x33   : > { %s320_s25 = scalar_lea.sflag [#allocation10], %s319_s23 }
  0x34   : > { %1144 = dma.done.wait (%p1299_p0), %s320_s25, 128  }
  0x35   : > { %1146 = vsyncadd (%p1299_p0), %s320_s25, 4294967168 }
  0x36   : > { %1148 = dma.done.wait (%p68_p1), [#allocation10], 512  }
  0x37   : > { %1150 = vsyncadd (%p68_p1), [#allocation10], 4294966784 }
  0x38   : > { %1152 = dma.done.wait (%p68_p1), [#allocation13], 512  }
  0x39   : > { %1154 = vsyncadd (%p68_p1), [#allocation13], 4294966784  ;;  %v384_v0 = vld [vmem:[#allocation11 + $0x18] sm:$0xff]  ;;  %v383_v2 = vld [vmem:[#allocation11 + $0x10] sm:$0xff]  ;;  %vm389_vm0 = vcmask 261120   ;;  %vm377_vm1 = vcmask 130048  }
  0x3a   : > { %v419_v1 = vld [vmem:[#allocation12 + $0x18] sm:$0xff]  ;;  %405 = vmatpush.msra.mxu0 %v384_v0  ;;  %v418_v3 = vld [vmem:[#allocation12 + $0x10] sm:$0xff]  ;;  %v382_v4 = vld [vmem:[#allocation11 + $0x8] sm:$0xff]  ;;  %s1187_s9 = smov 96   ;;  %s1188_s10 = smov 112   ;;  %vm372_vm2 = vcmask 7168  }
  0x3b   : > { %440 = vmatpush.msra.mxu1 %v419_v1  ;;  %v417_v5 = vld [vmem:[#allocation12 + $0x8] sm:$0xff]  ;;  %v381_v6 = vld [vmem:[#allocation11] sm:$0xff]  ;;  %v415_v9 = vld [vmem:[%s323_s7] sm:$0xff]  ;;  %v1189_v18 = vmov -inf   ;;  %vm477_vm3 = vcmask 64512   ;;  %v1190_v23 = vmov 0  }
  0x3c   : > { %406 = vmatpush.msra.mxu0 %v383_v2  ;;  %v416_v7 = vld [vmem:[#allocation12] sm:$0xff]  ;;  %v953_v10 = vld [vmem:[%s1435_s3] ss:$0 sm:$0xff]  ;;  %373 = vst.msk [vmem:[#allocation3] sm:$0xff] %vm372_vm2, %v1189_v18  ;;  %950 = vset.pattern.permute.xlu0 %v1190_v23  ;;  %v1191_v24 = vmov 0.0   ;;  %s1192_s12 = smov 80  }
  0x3d   : > { %441 = vmatpush.msra.mxu1 %v418_v3  ;;  %v380_v8 = vld [vmem:[%s313_s4] sm:$0xff]  ;;  %374 = vst.msk [vmem:[#allocation3 + $0x8] sm:$0xff] %vm372_vm2, %v1189_v18  ;;  %951 = vset.pattern.permute.xlu1 %v1190_v23  ;;  %s1193_s14 = smov 16   ;;  %s850_s15 = sshll.u32 %s1173_s24, 3 }
  0x3e   : > { %407 = vmatpush.msra.mxu0 %v382_v4  ;;  %v954_v11 = vld [vmem:[%s1437_s5] ss:$0 sm:$0xff]  ;;  %952 = vset.pattern.permute.xlu2 %v1190_v23  ;;  %375 = vst.msk [vmem:[#allocation4] sm:$0xff] %vm372_vm2, %v1191_v24  ;;  %s694_s17 = scalar_lea.hbm %s1438_s6, %s850_s15  ;;  %s367_s19 = scalar_lea.vmem [#allocation14], %s1332_s11 }
  0x3f   : > { %442 = vmatpush.msra.mxu1 %v417_v5  ;;  %379 = vst.msk [vmem:[#allocation5 + $0x8] sm:$0xff] %vm377_vm1, %v1191_v24  ;;  %s696_s13 = sshll.u32 %s367_s19, 4  ;;  %s698_s2 = sshll.u32 %s694_s17, 4  ;;  %s697_s13 = int_to_ptr.vmem [resolvable:$true] %s696_s13  ;;  %s699_s2 = int_to_ptr.hbm [resolvable:$true] %s698_s2 }
  0x40   : > { %408 = vmatpush.msra.mxu0 %v381_v6  ;;  %376 = vst.msk [vmem:[#allocation4 + $0x8] sm:$0xff] %vm372_vm2, %v1191_v24  ;;  %s683_s4 = scalar_lea.sflag [#allocation8], %s1329_s20  ;;  %s1101_s24 = sshra.s32 %s699_s2, 4  ;;  %s1102_s24 = int_to_ptr.hbm [resolvable:$true] %s1101_s24 }
  0x41   : > { %443 = vmatpush.msra.mxu1 %v416_v7  ;;  %841 = vmatmul.msk.f32.vlgmr.msra.gmra.mxu0 %vm389_vm0, %v380_v8  ;;  %378 = vst.msk [vmem:[#allocation5] sm:$0xff] %vm377_vm1, %v1191_v24  ;;  %s1103_s23 = scalar_lea.hbm %s1102_s24, 8  ;;  %s1107_s7 = scalar_lea.hbm %s1438_s6, 16 }
  0x42   : > { %842 = vmatmul.msk.f32.vlgmr.msra.gmra.mxu1 %vm389_vm0, %v415_v9  ;;  %p1104_p1 = scmp.ne.s32.totalorder %s1102_s24, %s1103_s23  ;;  %p1108_p10 = scmp.lt.s32.totalorder %s1102_s24, %s1438_s6 }
  0x43   : > { %v476_v25 = vld [vmem:[#allocation3] sm:$0xff]  ;;  %p1109_p11 = scmp.lt.s32.totalorder %s1107_s7, %s1103_s23 }
  0x44   : > { %v568_v44 = vld [vmem:[#allocation3 + $0x8] sm:$0xff]  ;;  %p1105_p3 = pnand %p1104_p1, %p1303_p2 }
  0x45   : > { %v493_v37 = vld [vmem:[#allocation4] sm:$0xff]  ;;  %p1110_p12 = por %p1109_p11, %p1108_p10 }
  0x46   : > { %v593_v62 = vld [vmem:[#allocation5 + $0x8] sm:$0xff]  ;;  %p1106_p9 = pneg %p1105_p3 }
  0x47   : > { %v585_v56 = vld [vmem:[#allocation4 + $0x8] sm:$0xff] }
  0x48   : > { %p1111_p13 = pnand %p1110_p12, %p1106_p9 }
  0xbe   : > { %v410_v12 = vpop.f32.mrf.mxu0 }
  0xbf   : > { %v445_v13 = vpop.f32.mrf.mxu1  ;;  %v411_v14 = vadd.f32 %v953_v10, %v410_v12  ;;  %v501_v10 = vld [vmem:[#allocation5] sm:$0xff] }
  0xc0   : > { %v1362_v15 = vadd.f32 %v954_v11, %v445_v13 }
  0xc1   : > { %v413_v16 = vmul.f32 0.25, %v411_v14 }
  0xc2   : > { %508 = vrot.lane.b32.xlu1 %v1362_v15, %s1187_s9  ;;  %843 = vmatpush.xpose.msk.msra.mxu2 %vm377_vm1, %v1362_v15 }
  0xc3   : > { %414 = vst.msk [vmem:[#allocation2] sm:$0xff] %vm389_vm0, %v413_v16 }
  0xca   : > { %541 = vrot.lane.b32.xlu1 %v1362_v15, %s1188_s10  ;;  %v537_v17 = vld [vmem:[#allocation2] sm:$0xff] }
  0xcb   : > { %539 = vrot.lane.b32.xlu2 %v537_v17, %s1188_s10  ;;  %844 = vmatmul.msk.f32.vlgmr.msra.gmra.mxu2 %vm377_vm1, %v537_v17 }
 0x125   : > { %v540_v34 = vpop.permute.xlu2 %539 }
 0x134   : > { %v509_v19 = vpop.permute.xlu1 %508 }
 0x135   : > { %529 = vmatpush.msra.mxu3 %v509_v19 }
 0x13c   : > { %v542_v20 = vpop.permute.xlu1 %541 }
 0x13d   : > { %846 = vmatpush.xpose.msk.msrb.mxu3 %vm377_vm1, %v542_v20 }
 0x14e   : > { %v473_v21 = vpop.f32.mrf.mxu2 }
 0x14f   : > { %v478_v22 = vsel %vm477_vm3, %v473_v21, -inf }
 0x150   : > { %479 = vmax.xlane.f32.xlu0 %v478_v22 }
 0x1c3   : > { %v480_v26 = vpop.xlane.xlu0 %479 }
 0x1c4   : > { %v481_v27 = vmax.f32 %v476_v25, %v480_v26 }
 0x1c6   : > { %v482_v28 = vsub.f32 %v476_v25, %v481_v27  ;;  %536 = vst.msk [vmem:[#allocation3] sm:$0xff] %vm372_vm2, %v481_v27  ;;  %487 = vperm.xlu0 %950, %v481_v27  }
 0x1c8   : > { %v483_v35 = vmul.f32 1.442695, %v482_v28 }
 0x238   : > { %v488_v29 = vpop.permute.xlu0 %487 }
 0x239   : > { %v490_v30 = vsub.f32 %v473_v21, %v488_v29 }
 0x23b   : > { %v491_v31 = vmul.f32 1.442695, %v490_v30 }
 0x23d   : > { %955 = vpow2.f32 %v491_v31 }
 0x23e   : > { %957 = vpow2.f32 %v483_v35 }
 0x243   : > { %v956_v32 = vpop.eup %955 }
 0x244   : > { %845 = vmatmul.msk.f32.vlgmr.msra.gmra.mxu3 %vm477_vm3, %v956_v32  ;;  %v495_v33 = vsel %vm477_vm3, %v956_v32, 0.0  ;;  %v958_v36 = vpop.eup %957 }
 0x245   : > { %496 = vadd.xlane.f32.xlu0 %v495_v33  ;;  %v494_v38 = vmul.f32 %v958_v36, %v493_v37 }
 0x24c   : > { %847 = vmatmul.msk.f32.vlgmr.msrb.gmra.mxu3 %vm377_vm1, %v540_v34 }
 0x2b8   : > { %v497_v39 = vpop.xlane.xlu0 %496 }
 0x2b9   : > { %v498_v40 = vadd.f32 %v497_v39, %v494_v38 }
 0x2bb   : > { %500 = vst.msk [vmem:[#allocation4] sm:$0xff] %vm372_vm2, %v498_v40 }
 0x2c2   : > { %v633_v60 = vld [vmem:[#allocation4] sm:$0xff] }
 0x2c3   : > { %v645_v22 = vand.u32 2147483648, %v633_v60  ;;  %vm639_vm9 = vweird.f32 %v633_v60  ;;  %v643_v23 = vand.u32 2147483647, %v633_v60 }
 0x2c5   : > { %v646_v25 = vor.u32 1.1754944e-38, %v645_v22  ;;  %vm644_vm11 = vcmp.eq.f32.partialorder %v643_v23, 8.507059e+37 }
 0x2c7   : > { %v531_v41 = vpop.f32.mrf.mxu3 }
 0x2cf   : > { %v564_v42 = vpop.f32.mrf.mxu3 }
 0x2d0   : > { %v569_v43 = vsel %vm477_vm3, %v564_v42, -inf }
 0x2d1   : > { %570 = vmax.xlane.f32.xlu2 %v569_v43 }
 0x344   : > { %v571_v45 = vpop.xlane.xlu2 %570 }
 0x345   : > { %v572_v46 = vmax.f32 %v568_v44, %v571_v45 }
 0x347   : > { %v573_v47 = vsub.f32 %v568_v44, %v572_v46  ;;  %628 = vst.msk [vmem:[#allocation3 + $0x8] sm:$0xff] %vm372_vm2, %v572_v46  ;;  %578 = vperm.xlu1 %951, %v572_v46  }
 0x349   : > { %v574_v48 = vmul.f32 1.442695, %v573_v47 }
 0x34b   : > { %959 = vpow2.f32 %v574_v48 }
 0x34f   : > { %600 = vrot.lane.b32.xlu1 %v1362_v15, %s1192_s12 }
 0x351   : > { %v960_v49 = vpop.eup %959 }
 0x352   : > { %596 = vperm.xlu2 %952, %v960_v49   ;;  %v586_v57 = vmul.f32 %v960_v49, %v585_v56 }
 0x3ac   : > { %v597_v63 = vpop.permute.xlu2 %596 }
 0x3ad   : > { %v599_v1 = vmul.f32 %v597_v63, %v593_v62 }
 0x3b9   : > { %v579_v50 = vpop.permute.xlu1 %578 }
 0x3ba   : > { %v581_v51 = vsub.f32 %v564_v42, %v579_v50 }
 0x3bc   : > { %v582_v52 = vmul.f32 1.442695, %v581_v51 }
 0x3be   : > { %961 = vpow2.f32 %v582_v52 }
 0x3bf   : > { %963 = vrcp.f32 %v633_v60 }
 0x3c1   : > { %v601_v53 = vpop.permute.xlu1 %600 }
 0x3c2   : > { %621 = vmatpush.msrb.mxu2 %v601_v53 }
 0x3c4   : > { %v962_v54 = vpop.eup %961 }
 0x3c5   : > { %848 = vmatmul.msk.f32.vlgmr.msrb.gmra.mxu2 %vm477_vm3, %v962_v54  ;;  %v587_v55 = vsel %vm477_vm3, %v962_v54, 0.0  ;;  %v964_v0 = vpop.eup %963 }
 0x3c6   : > { %588 = vadd.xlane.f32.xlu1 %v587_v55  ;;  %v635_v4 = vmul.f32 %v964_v0, %v633_v60  ;;  %vm640_vm8 = vweird.f32 %v964_v0 }
 0x3c7   : > { %vm641_vm10 = vmor %vm639_vm9, %vm640_vm8 }
 0x3c8   : > { %v636_v8 = vsub.f32 1.0, %v635_v4 }
 0x3ca   : > { %v637_v15 = vmul.f32 %v964_v0, %v636_v8 }
 0x3cc   : > { %v638_v21 = vadd.f32 %v964_v0, %v637_v15 }
 0x3ce   : > { %v642_v24 = vsel %vm641_vm10, %v964_v0, %v638_v21 }
 0x3cf   : > { %v647_v26 = vsel %vm644_vm11, %v646_v25, %v642_v24 }
 0x3df   : > { %504 = vperm.xlu1 %951, %v958_v36  }
 0x439   : > { %v589_v58 = vpop.xlane.xlu1 %588 }
 0x43a   : > { %v590_v59 = vadd.f32 %v589_v58, %v586_v57 }
 0x43c   : > { %591 = vst.msk [vmem:[#allocation4 + $0x8] sm:$0xff] %vm372_vm2, %v590_v59 }
 0x443   : > { %v655_v61 = vld [vmem:[#allocation4 + $0x8] sm:$0xff] }
 0x444   : > { %965 = vrcp.f32 %v655_v61  ;;  %v667_v9 = vand.u32 2147483648, %v655_v61  ;;  %v665_v12 = vand.u32 2147483647, %v655_v61  ;;  %vm661_vm5 = vweird.f32 %v655_v61 }
 0x446   : > { %v668_v17 = vor.u32 1.1754944e-38, %v667_v9  ;;  %vm666_vm7 = vcmp.eq.f32.partialorder %v665_v12, 8.507059e+37 }
 0x448   : > { %v623_v2 = vpop.f32.mrf.mxu2 }
 0x449   : > { %v626_v3 = vadd.f32 %v623_v2, %v599_v1 }
 0x44a   : > { %v966_v5 = vpop.eup %965 }
 0x44b   : > { %627 = vst.msk [vmem:[#allocation5 + $0x8] sm:$0xff] %vm377_vm1, %v626_v3  ;;  %v657_v6 = vmul.f32 %v966_v5, %v655_v61  ;;  %vm662_vm4 = vweird.f32 %v966_v5 }
 0x44c   : > { %vm663_vm6 = vmor %vm661_vm5, %vm662_vm4 }
 0x44d   : > { %v658_v7 = vsub.f32 1.0, %v657_v6 }
 0x44f   : > { %v659_v11 = vmul.f32 %v966_v5, %v658_v7 }
 0x451   : > { %v505_v13 = vpop.permute.xlu1 %504  ;;  %v660_v14 = vadd.f32 %v966_v5, %v659_v11 }
 0x452   : > { %v507_v16 = vmul.f32 %v505_v13, %v501_v10  ;;  %v654_v27 = vld [vmem:[#allocation5 + $0x8] sm:$0xff] }
 0x453   : > { %v664_v18 = vsel %vm663_vm6, %v966_v5, %v660_v14 }
 0x454   : > { %v534_v19 = vadd.f32 %v531_v41, %v507_v16  ;;  %v669_v20 = vsel %vm666_vm7, %v668_v17, %v664_v18 }
 0x455   : > { %672 = vperm.xlu2 %952, %v669_v20  }
 0x456   : > { %535 = vst.msk [vmem:[#allocation5] sm:$0xff] %vm377_vm1, %v534_v19 }
 0x45d   : > { %650 = vperm.xlu2 %952, %v647_v26   ;;  %v632_v31 = vld [vmem:[#allocation5] sm:$0xff] }
 0x4af   : > { %v673_v28 = vpop.permute.xlu2 %672 }
 0x4b0   : > { %v675_v29 = vmul.f32 %v673_v28, %v654_v27 }
 0x4b2   : > { %677 = vrot.lane.b32.xlu2 %v675_v29, %s1193_s14 }
 0x4b7   : > { %v651_v30 = vpop.permute.xlu2 %650 }
 0x4b8   : > { %v653_v32 = vmul.f32 %v651_v30, %v632_v31 }
 0x50c   : > { %v678_v33 = vpop.permute.xlu2 %677 }
 0x50d   : > { %v680_v34 = vsel %vm377_vm1, %v653_v32, %v678_v33 }
 0x50e   : > { %681 = vst.msk [vmem:[%s367_s19] sm:$0xff] %vm389_vm0, %v680_v34 }
 0x50f   : > { %1114 = shalt.err (!%p1111_p13)
}
 0x510   : > { %865 = dma.vmem_to_hbm [thread:$0]  (%p1303_p2), %s697_s13, 128, %s699_s2, %s683_s4  }
 0x511 PF: > { %s710_s29 = sand.u32 1, %s1161_s21   ;;  %p882_p0 = pnand %p830_p6, %p1310_p5 }
 0x512   : > { %s711_s8 = scalar_lea.sflag [#allocation8], %s710_s29 }
 0x513   : > { %p883_p4 = pneg %p882_p0 }
 0x515   : > { %1156 = dma.done.wait (%p883_p4), %s711_s8, 128  }
 0x516   : > { %1158 = vsyncadd (%p883_p4), %s711_s8, 4294967168  ;;  %s26_s26 = sadd.s32 1, %s1181_s26   ;;  %s1458_s9 = sld [smem:[#allocation20_spill]] }
 0x517   : > { %p23_p7 = scmp.ge.s32.totalorder %s26_s26, 4   ;;  %s1459_s23 = sld [smem:[#allocation23_spill]] }
 0x518   : > { %s1460_s24 = sld [smem:[#allocation21_spill]]  ;;  %s1462_s21 = smov %s1165_s22 }
 0x519   : > { %s1461_s25 = sld [smem:[#allocation22_spill]]  ;;  %25 = sbr.rel (!%p23_p7) target bundleno = 12 (0xc), region = 121 }
 0x51c   : > { %s1463_s22 = smov %s1458_s9 }
 0x51e   :  { %717 = vsyncpa [#allocation7], 1 }
 0x51f   :  { %719 = vsyncpa [#allocation7 + $0x1], 1 }
 0x520   :  { %720 = vsyncpa [#allocation10], 1 }
 0x521   :  { %722 = vsyncpa [#allocation10 + $0x1], 1 }
 0x522   :  { %723 = vsyncpa [#allocation13], 1 }
 0x523   :  { %724 = vsyncpa [#allocation8], 1 }
 0x524   :  { %726 = vsyncpa [#allocation8 + $0x1], 1 }

</bundles_post_ra>
